<compile_context>
chip_gen: v6e
topology: v6e:2x2x1
jax: 0.10.0
libtpu: 0.0.40
codegen_flags: <defaults>
</compile_context>

<pallas_src>
import math
from functools import partial

import numpy as np
import jax
import jax.numpy as jnp
from jax.experimental import pallas as pl
from jax.experimental.pallas import tpu as pltpu

_LANE = 128
_SUBLANE = 8


def _round_up(x, m):
    return ((x + m - 1) // m) * m


def _nerf_posenc_kernel(x_ref, scale_ref, phase_ref, o_ref, *,
                        num_frequencies, chunk):
    """Refs (all VMEM, batch on the 128-lane axis):
      x_ref:     (in_dim, TC)       f32 coords
      scale_ref: (2*total_f, 1)     f32 per-output-row 2^i*pi (sin & cos rows)
      phase_ref: (2*total_f, 1)     f32 per-output-row phase (0 for sin, pi/2 for cos)
      o_ref:     (out_dim, TC)      f32 output tile
    """
    in_dim = len(num_frequencies)
    tc = o_ref.shape[1]
    n_chunks = tc // chunk            # wrapper guarantees exact division

    @pl.loop(0, n_chunks)
    def _(c):
        col = pl.multiple_of(c * chunk, _LANE)
        xs = x_ref[:, pl.ds(col, chunk)]               # (in_dim, chunk)
        pieces = [xs]                                  # pass-through coord rows
        row = 0
        for j, nf in enumerate(num_frequencies):
            if nf == 0:
                continue
            sc = scale_ref[row:row + 2 * nf, :]        # (2*nf, 1)
            ph = phase_ref[row:row + 2 * nf, :]        # (2*nf, 1)
            # (2nf,1)*(1,chunk)+(2nf,1) -> (2nf,chunk); rows already interleaved
            # sin0,cos0,sin1,cos1,... because cos(a) == sin(a + pi/2).
            ang = sc * xs[j:j + 1, :] + ph
            pieces.append(jnp.sin(ang))
            row += 2 * nf
        # ONE contiguous, sublane-offset-0, lane-dense store per chunk covering
        # all out_dim rows (coords + every sin/cos row) in PyTorch order.
        o_ref[:, pl.ds(col, chunk)] = jnp.concatenate(pieces, axis=0)


def nerf_pos_encoding(coords, num_frequencies, *, tile_cols=16384,
                      chunk_cols=512, transpose_output=True):
    """JAX wrapper mirroring PosEncodingNeRF.forward.

    coords: array whose elements reshape to (coords.shape[0], in_dim)
            (same contract as the PyTorch `view(coords.shape[0], in_dim)`).
    num_frequencies: per-dimension frequency counts (len == in_dim).
    transpose_output: True  -> (N, out_dim)  (module layout, default)
                      False -> (out_dim, N)  lane-dense; feed the next matmul
                               K-major and skip the XLA transpose entirely.
    """
    num_frequencies = tuple(int(f) for f in num_frequencies)
    in_dim = len(num_frequencies)
    total_f = int(sum(num_frequencies))
    assert in_dim >= 1 and total_f >= 1
    out_dim = in_dim + 2 * total_f

    n = coords.shape[0]
    coords = coords.reshape(n, in_dim).astype(jnp.float32)

    # ---- tiling: batch N lives on the 128-lane axis (lane-dense stores) ----
    n_lanes = _round_up(max(n, 1), _LANE)
    tc = min(int(tile_cols), n_lanes)
    if n_lanes >= 2 * _LANE:
        # Guarantee >= 2 grid steps so ("parallel",) shards across both v7x TCs.
        tc = min(tc, _round_up(pl.cdiv(n_lanes, 2), _LANE))
    tc = max(_LANE, (tc // _LANE) * _LANE)

    chunk = max(_LANE, (min(int(chunk_cols), tc) // _LANE) * _LANE)
    tc = _round_up(tc, chunk)            # in-kernel loop trip count is exact
    n_pad = _round_up(n, tc)

    coords_t = jnp.pad(coords.T, ((0, 0), (0, n_pad - n)))     # (in_dim, n_pad)

    # Per-output-row constants, passed as kernel INPUTS (kernels may not
    # capture array constants).  Row 2k -> sin, row 2k+1 -> cos (phase pi/2).
    scale_np = np.zeros((2 * total_f, 1), np.float32)
    phase_np = np.zeros((2 * total_f, 1), np.float32)
    r = 0
    for nf in num_frequencies:
        for i in range(nf):
            s = np.float32((2.0 ** i) * math.pi)
            scale_np[r, 0] = s
            scale_np[r + 1, 0] = s
            phase_np[r + 1, 0] = np.float32(math.pi / 2.0)
            r += 2
    scale = jnp.asarray(scale_np)
    phase = jnp.asarray(phase_np)

    # Raise the scoped-VMEM limit only if the double-buffered tiles outgrow
    # v5e's 16 MiB default (defaults already cover tile_cols<=16384).
    vmem_est = 2 * 4 * tc * (_round_up(in_dim, _SUBLANE) + _round_up(out_dim, _SUBLANE))
    cp_kwargs = dict(dimension_semantics=("parallel",))
    if vmem_est > 12 * 1024 * 1024:
        cp_kwargs["vmem_limit_bytes"] = int(min(2 * vmem_est, 56 * 1024 * 1024))

    kernel = partial(_nerf_posenc_kernel,
                     num_frequencies=num_frequencies, chunk=chunk)

    out_t = pl.pallas_call(
        kernel,
        out_shape=jax.ShapeDtypeStruct((out_dim, n_pad), jnp.float32),
        grid_spec=pltpu.PrefetchScalarGridSpec(
            num_scalar_prefetch=0,
            grid=(n_pad // tc,),
            in_specs=[
                # second-to-last dims equal the full array extent; last dims are
                # multiples of 128 (or the full extent) -> (8,128) rule satisfied.
                pl.BlockSpec((in_dim, tc), lambda c: (0, c)),
                pl.BlockSpec((2 * total_f, 1), lambda c: (0, 0)),
                pl.BlockSpec((2 * total_f, 1), lambda c: (0, 0)),
            ],
            out_specs=pl.BlockSpec((out_dim, tc), lambda c: (0, c)),
        ),
        compiler_params=pltpu.CompilerParams(**cp_kwargs),
    )(coords_t, scale, phase)

    out_t = out_t[:, :n]                 # (out_dim, n), lane-dense
    if transpose_output:
        return out_t.T                   # (n, out_dim) — PyTorch module layout
    return out_t


def _reference(coords, num_frequencies):
    """Pure-JAX port of the PyTorch forward, for verification."""
    in_dim = len(num_frequencies)
    coords = coords.reshape(coords.shape[0], in_dim)
    out = coords
    for j, dim_freqs in enumerate(num_frequencies):
        for i in range(dim_freqs):
            c = coords[..., j]
            s = jnp.expand_dims(jnp.sin(2 ** i * math.pi * c), -1)
            co = jnp.expand_dims(jnp.cos(2 ** i * math.pi * c), -1)
            out = jnp.concatenate((out, s, co), axis=-1)
    return out


if __name__ == "__main__":
    # Module config: in_dim=3, per-dim frequency counts (4, 3, 2)
    # -> out_dim = 3 + 2*(4+3+2) = 21
    num_frequencies = (4, 3, 2)
    in_dim = len(num_frequencies)
    out_dim = in_dim + 2 * sum(num_frequencies)

    # Small batch: single grid step, single in-kernel chunk, lane padding.
    n = 16
    coords = jax.random.uniform(jax.random.PRNGKey(0), (n, in_dim),
                                dtype=jnp.float32, minval=-1.0, maxval=1.0)
    out = jax.block_until_ready(nerf_pos_encoding(coords, num_frequencies))
    ref = _reference(coords, num_frequencies)
    assert out.shape == (n, out_dim)
    assert jnp.allclose(out, ref, atol=1e-5, rtol=1e-5), "mismatch vs reference (n=16)"

    # Non-multiple batch: multi-step parallel grid + multi-chunk inner loop.
    n2 = 300
    coords2 = jax.random.uniform(jax.random.PRNGKey(1), (n2, in_dim),
                                 dtype=jnp.float32, minval=-1.0, maxval=1.0)
    out2 = jax.block_until_ready(
        nerf_pos_encoding(coords2, num_frequencies, tile_cols=256, chunk_cols=128))
    ref2 = _reference(coords2, num_frequencies)
    assert out2.shape == (n2, out_dim)
    assert jnp.allclose(out2, ref2, atol=1e-5, rtol=1e-5), "mismatch vs reference (n=300)"

    # Default tiling path + lane-dense (out_dim, N) output (no wrapper transpose).
    n3 = 1000
    coords3 = jax.random.uniform(jax.random.PRNGKey(2), (n3, in_dim),
                                 dtype=jnp.float32, minval=-1.0, maxval=1.0)
    out3_t = jax.block_until_ready(
        nerf_pos_encoding(coords3, num_frequencies, transpose_output=False))
    ref3 = _reference(coords3, num_frequencies)
    assert out3_t.shape == (out_dim, n3)
    assert jnp.allclose(out3_t.T, ref3, atol=1e-5, rtol=1e-5), "mismatch vs reference (n=1000)"

    print("KERNEL_OK")
</pallas_src>

<mosaic_0001>
module attributes {stable_mosaic.version = 11 : i64} {
  func.func @_nerf_posenc_kernel(%arg0: i32, %arg1: memref<3x128xf32, #tpu.memory_space<vmem>>, %arg2: memref<18x1xf32, #tpu.memory_space<vmem>>, %arg3: memref<18x1xf32, #tpu.memory_space<vmem>>, %arg4: memref<21x128xf32, #tpu.memory_space<vmem>>) attributes {dimension_semantics = [#tpu.dimension_semantics<parallel>], iteration_bounds = array<i64: 1>, scalar_prefetch = 0 : i64, scratch_operands = 0 : i64, tpu.core_type = #tpu.core_type<tc>, window_params = [{transform_indices = @transform_0, window_bounds = array<i64: 3, 128>}, {pipeline_mode = #tpu.pipeline_mode<synchronous>, transform_indices = @transform_1, window_bounds = array<i64: 18, 1>}, {pipeline_mode = #tpu.pipeline_mode<synchronous>, transform_indices = @transform_2, window_bounds = array<i64: 18, 1>}, {transform_indices = @transform_3, window_bounds = array<i64: 21, 128>}]} {
    %c0_i32 = arith.constant 0 : i32
    %c1_i32 = arith.constant 1 : i32
    %0 = arith.muli %c0_i32, %c1_i32 : i32
    %c0_i32_0 = arith.constant 0 : i32
    %1 = arith.addi %c0_i32_0, %0 : i32
    %c128_i32 = arith.constant 128 : i32
    %2 = arith.muli %1, %c128_i32 : i32
    %3 = tpu.assume_multiple %2, 128 : i32
    %c0 = arith.constant 0 : index
    %4 = arith.index_cast %3 : i32 to index
    %5 = vector.load %arg1[%c0, %4] : memref<3x128xf32, #tpu.memory_space<vmem>>, vector<3x128xf32>
    %c0_1 = arith.constant 0 : index
    %c0_2 = arith.constant 0 : index
    %6 = vector.load %arg2[%c0_1, %c0_2] : memref<18x1xf32, #tpu.memory_space<vmem>>, vector<8x1xf32>
    %c0_3 = arith.constant 0 : index
    %c0_4 = arith.constant 0 : index
    %7 = vector.load %arg3[%c0_3, %c0_4] : memref<18x1xf32, #tpu.memory_space<vmem>>, vector<8x1xf32>
    %8 = vector.extract_strided_slice %5 {offsets = [0, 0], sizes = [1, 128], strides = [1, 1]} : vector<3x128xf32> to vector<1x128xf32>
    %9 = vector.broadcast %6 : vector<8x1xf32> to vector<8x128xf32>
    %10 = vector.broadcast %8 : vector<1x128xf32> to vector<8x128xf32>
    %11 = arith.mulf %9, %10 : vector<8x128xf32>
    %12 = vector.broadcast %7 : vector<8x1xf32> to vector<8x128xf32>
    %13 = arith.addf %11, %12 : vector<8x128xf32>
    %14 = math.sin %13 : vector<8x128xf32>
    %c8 = arith.constant 8 : index
    %c0_5 = arith.constant 0 : index
    %15 = vector.load %arg2[%c8, %c0_5] : memref<18x1xf32, #tpu.memory_space<vmem>>, vector<6x1xf32>
    %c8_6 = arith.constant 8 : index
    %c0_7 = arith.constant 0 : index
    %16 = vector.load %arg3[%c8_6, %c0_7] : memref<18x1xf32, #tpu.memory_space<vmem>>, vector<6x1xf32>
    %17 = vector.extract_strided_slice %5 {offsets = [1, 0], sizes = [1, 128], strides = [1, 1]} : vector<3x128xf32> to vector<1x128xf32>
    %18 = vector.broadcast %15 : vector<6x1xf32> to vector<6x128xf32>
    %19 = vector.broadcast %17 : vector<1x128xf32> to vector<6x128xf32>
    %20 = arith.mulf %18, %19 : vector<6x128xf32>
    %21 = vector.broadcast %16 : vector<6x1xf32> to vector<6x128xf32>
    %22 = arith.addf %20, %21 : vector<6x128xf32>
    %23 = math.sin %22 : vector<6x128xf32>
    %c14 = arith.constant 14 : index
    %c0_8 = arith.constant 0 : index
    %24 = vector.load %arg2[%c14, %c0_8] : memref<18x1xf32, #tpu.memory_space<vmem>>, vector<4x1xf32>
    %c14_9 = arith.constant 14 : index
    %c0_10 = arith.constant 0 : index
    %25 = vector.load %arg3[%c14_9, %c0_10] : memref<18x1xf32, #tpu.memory_space<vmem>>, vector<4x1xf32>
    %26 = vector.extract_strided_slice %5 {offsets = [2, 0], sizes = [1, 128], strides = [1, 1]} : vector<3x128xf32> to vector<1x128xf32>
    %27 = vector.broadcast %24 : vector<4x1xf32> to vector<4x128xf32>
    %28 = vector.broadcast %26 : vector<1x128xf32> to vector<4x128xf32>
    %29 = arith.mulf %27, %28 : vector<4x128xf32>
    %30 = vector.broadcast %25 : vector<4x1xf32> to vector<4x128xf32>
    %31 = arith.addf %29, %30 : vector<4x128xf32>
    %32 = math.sin %31 : vector<4x128xf32>
    %33 = tpu.concatenate %5, %14, %23, %32 in 0 : vector<3x128xf32>, vector<8x128xf32>, vector<6x128xf32>, vector<4x128xf32> -> vector<21x128xf32>
    %c0_11 = arith.constant 0 : index
    %34 = arith.index_cast %3 : i32 to index
    %35 = vector.load %arg4[%c0_11, %34] : memref<21x128xf32, #tpu.memory_space<vmem>>, vector<21x128xf32>
    tpu.vector_store %arg4[%c0_11, %34], %33 {strides = array<i32>} : memref<21x128xf32, #tpu.memory_space<vmem>>, vector<21x128xf32>,
    %c1_i32_12 = arith.constant 1 : i32
    return
  }
  func.func @transform_0(%arg0: i32) -> (i32, i32) {
    %c0_i32 = arith.constant 0 : i32
    %c0_i32_0 = arith.constant 0 : i32
    return %c0_i32, %arg0 : i32, i32
  }
  func.func @transform_1(%arg0: i32) -> (i32, i32) {
    %c0_i32 = arith.constant 0 : i32
    %c0_i32_0 = arith.constant 0 : i32
    %c0_i32_1 = arith.constant 0 : i32
    return %c0_i32, %c0_i32_0 : i32, i32
  }
  func.func @transform_2(%arg0: i32) -> (i32, i32) {
    %c0_i32 = arith.constant 0 : i32
    %c0_i32_0 = arith.constant 0 : i32
    %c0_i32_1 = arith.constant 0 : i32
    return %c0_i32, %c0_i32_0 : i32, i32
  }
  func.func @transform_3(%arg0: i32) -> (i32, i32) {
    %c0_i32 = arith.constant 0 : i32
    %c0_i32_0 = arith.constant 0 : i32
    return %c0_i32, %arg0 : i32, i32
  }
}

</mosaic_0001>

<bundles_post_ra>
// kernel: tpu_custom_call.1
= control target key start
LH: loop header
LB: loop body
LE: loop exit
PB: predicated region body
PF: predicated region fallthrough
CT: control target
= control target key end

     0   :  { %v485_v2 = vmov 0   ;;  %s729_s0 = inlined_call_operand.vmem [shape: f32[3,128], index: 0, kind: input, shape index: {}]   ;;  %s730_s1 = inlined_call_operand.vmem [shape: f32[18,1], index: 1, kind: input, shape index: {}]   ;;  %s731_s2 = inlined_call_operand.vmem [shape: f32[18,1], index: 2, kind: input, shape index: {}]   ;;  %s732_s3 = inlined_call_operand.hbm [shape: f32[21,128], index: 3, kind: output, shape index: {}]  }
   0x1   :  { %v260_v0 = vld [vmem:[%s730_s1 + $0xe] sm:$0xf]  ;;  %v16_v1 = vld [vmem:[%s730_s1] sm:$0xff]  ;;  %450 = vset.pattern.permute.xlu1 %v485_v2  ;;  %449 = vset.pattern.permute.xlu0 %v485_v2  ;;  %v138_v4 = vld [vmem:[%s730_s1 + $0x8] sm:$0x3f] }
   0x2   :  { %264 = vperm.xlu1 %450, %v260_v0   ;;  %20 = vperm.xlu0 %449, %v16_v1   ;;  %v17_v3 = vld [vmem:[%s731_s2] sm:$0xff] }
   0x3   :  { %8 = vsyncpa [#allocation3], 0  ;;  %v261_v5 = vld [vmem:[%s731_s2 + $0xe] sm:$0xf]  ;;  %v139_v6 = vld [vmem:[%s731_s2 + $0x8] sm:$0x3f]  ;;  %v23_v7 = vlaneseq }
   0x4   :  { %v536_v10 = vld [vmem:[%s729_s0] sm:$0x7]  ;;  %v486_v49 = vmov 683565275   ;;  %v487_v51 = vmov 2475754826  }
   0x5   :  { %v24_v8 = vshrl.u32 %v23_v7, 7  ;;  %v488_v54 = vmov 2131351028   ;;  %v489_v56 = vmov 2102212464   ;;  %s492_s0 = smov [#allocation2]  }
   0x6   :  { %30 = vperm.xlu1 %450, %v17_v3   ;;  %142 = vperm.xlu0 %449, %v138_v4   ;;  %v490_v58 = vmov 920167782   ;;  %v491_v1 = vmov 1326507024   ;;  %s404_s1 = sshll.u32 %s492_s0, 4  ;;  %s405_s1 = int_to_ptr.vmem [resolvable:$true] %s404_s1 }
   0x7   :  { %v25_v9 = vsub.s32 0, %v24_v8  ;;  %v269_v11 = vsub.s32 2, %v24_v8  ;;  %v147_v15 = vsub.s32 1, %v24_v8  ;;  %s463_s2 = scalar_lea.vmem %s405_s1, 384  ;;  %p468_p1 = scmp.lt.s32.totalorder %s405_s1, %s405_s1 }
   0x8   :  { %p464_p0 = scmp.ne.s32.totalorder %s405_s1, %s463_s2  ;;  %p469_p2 = scmp.lt.s32.totalorder %s463_s2, %s463_s2 }
   0x9   :  { %v26_v12 = vrot.slane %v536_v10, %v25_v9  ;;  %v270_v16 = vrot.slane %v536_v10, %v269_v11  ;;  %v148_v20 = vrot.slane %v536_v10, %v147_v15 }
   0xa   :  { %274 = vperm.xlu1 %450, %v261_v5   ;;  %152 = vperm.xlu0 %449, %v139_v6   ;;  %p470_p3 = por %p469_p2, %p468_p1 }
   0xc   :  { %p471_p4 = pnand %p470_p3, %p464_p0 }
  0x7d   :  { %v265_v13 = vpop.permute.xlu1 %264  ;;  %v21_v14 = vpop.permute.xlu0 %20 }
  0x7e   :  { %v27_v17 = vmul.f32 %v26_v12, %v21_v14  ;;  %v271_v22 = vmul.f32 %v270_v16, %v265_v13 }
  0x81   :  { %v31_v18 = vpop.permute.xlu1 %30  ;;  %v143_v19 = vpop.permute.xlu0 %142 }
  0x82   :  { %v541_v21 = vadd.f32 %v31_v18, %v27_v17  ;;  %v149_v25 = vmul.f32 %v148_v20, %v143_v19 }
  0x84   :  { %v34_v23 = vand.u32 2147483647, %v541_v21  ;;  %v37_v24 = vand.u32 2139095040, %v541_v21 }
  0x85   :  { %v275_v26 = vpop.permute.xlu1 %274  ;;  %v153_v27 = vpop.permute.xlu0 %152 }
  0x86   :  { %v38_v28 = vshrl.u32 %v37_v24, 23  ;;  %v545_v29 = vadd.f32 %v275_v26, %v271_v22  ;;  %v41_v30 = vand.u32 8388607, %v34_v23  ;;  %v549_v31 = vadd.f32 %v153_v27, %v149_v25 }
  0x88   :  { %v415_v32 = vadd.s32 4294967169, %v38_v28  ;;  %v278_v33 = vand.u32 2147483647, %v545_v29  ;;  %v281_v34 = vand.u32 2139095040, %v545_v29  ;;  %v42_v36 = vor.u32 8388608, %v41_v30 }
  0x89   :  { %v159_v39 = vand.u32 2139095040, %v549_v31 }
  0x8a   :  { %v44_v35 = vadd.s32 1, %v415_v32  ;;  %v282_v37 = vshrl.u32 %v281_v34, 23  ;;  %v285_v38 = vand.u32 8388607, %v278_v33  ;;  %v556_v45 = vshll.u32 %v42_v36, 8 }
  0x8b   :  { %v160_v42 = vshrl.u32 %v159_v39, 23 }
  0x8c   :  { %vm45_vm0 = vcmp.gt.s32.totalorder %v44_v35, 0  ;;  %v423_v41 = vadd.s32 4294967169, %v282_v37  ;;  %v286_v46 = vor.u32 8388608, %v285_v38 }
  0x8d   :  { %v46_v40 = vsel %vm45_vm0, %v44_v35, 0  ;;  %v419_v53 = vadd.s32 4294967169, %v160_v42 }
  0x8e   :  { %v47_v43 = vshrl.u32 %v46_v40, 5  ;;  %v48_v44 = vand.u32 31, %v46_v40  ;;  %v288_v47 = vadd.s32 1, %v423_v41  ;;  %v578_v26 = vshll.u32 %v286_v46, 8 }
  0x8f   :  { %v166_v36 = vadd.s32 1, %v419_v53 }
  0x90   :  { %v49_v48 = vsub.s32 32, %v48_v44  ;;  %v51_v50 = vshll.u32 %v486_v49, %v48_v44  ;;  %v54_v52 = vshll.u32 %v487_v51, %v48_v44  ;;  %v57_v55 = vshll.u32 %v488_v54, %v48_v44 }
  0x91   :  { %v60_v57 = vshll.u32 %v489_v56, %v48_v44  ;;  %v63_v59 = vshll.u32 %v490_v58, %v48_v44  ;;  %vm66_vm1 = vcmp.lt.s32.totalorder %v47_v43, 1  ;;  %vm67_vm2 = vcmp.lt.s32.totalorder %v47_v43, 2 }
  0x92   :  { %v52_v60 = vshrl.u32 %v487_v51, %v49_v48  ;;  %v55_v61 = vshrl.u32 %v488_v54, %v49_v48  ;;  %v58_v62 = vshrl.u32 %v489_v56, %v49_v48  ;;  %v50_v63 = vshrl.u32 %v486_v49, %v49_v48 }
  0x93   :  { %v61_v0 = vshrl.u32 %v490_v58, %v49_v48  ;;  %v64_v2 = vshrl.u32 %v491_v1, %v49_v48  ;;  %vm68_vm3 = vcmp.lt.s32.totalorder %v47_v43, 3  ;;  %vm289_vm4 = vcmp.gt.s32.totalorder %v288_v47, 0 }
  0x94   :  { %v53_v3 = vor.u32 %v52_v60, %v51_v50  ;;  %v56_v4 = vor.u32 %v55_v61, %v54_v52  ;;  %v59_v5 = vor.u32 %v58_v62, %v57_v55  ;;  %vm69_vm5 = vcmp.lt.s32.totalorder %v47_v43, 4 }
  0x95   :  { %v62_v6 = vor.u32 %v61_v0, %v60_v57  ;;  %v65_v7 = vor.u32 %v64_v2, %v63_v59  ;;  %v290_v8 = vsel %vm289_vm4, %v288_v47, 0  ;;  %vm167_vm10 = vcmp.gt.s32.totalorder %v166_v36, 0 }
  0x96   :  { %v70_v9 = vsel %vm66_vm1, %v50_v63, %v53_v3  ;;  %v71_v11 = vsel %vm69_vm5, %v59_v5, 2102212464  ;;  %v74_v12 = vsel %vm66_vm1, %v53_v3, %v56_v4  ;;  %v78_v13 = vsel %vm66_vm1, %v56_v4, %v59_v5 }
  0x97   :  { %v72_v14 = vsel %vm68_vm3, %v56_v4, %v71_v11  ;;  %v75_v15 = vsel %vm69_vm5, %v62_v6, 920167782  ;;  %v79_v16 = vsel %vm69_vm5, %v65_v7, 1326507024  ;;  %v291_v17 = vshrl.u32 %v290_v8, 5 }
  0x98   :  { %v73_v18 = vsel %vm67_vm2, %v70_v9, %v72_v14  ;;  %v76_v19 = vsel %vm68_vm3, %v59_v5, %v75_v15  ;;  %v80_v20 = vsel %vm68_vm3, %v62_v6, %v79_v16  ;;  %v292_v22 = vand.u32 31, %v290_v8 }
  0x99   :  { %v77_v24 = vsel %vm67_vm2, %v74_v12, %v76_v19  ;;  %v81_v25 = vsel %vm67_vm2, %v78_v13, %v80_v20  ;;  %v89_v34 = vmul.u32 %v556_v45, %v73_v18  ;;  %vm310_vm6 = vcmp.lt.s32.totalorder %v291_v17, 1 }
  0x9a   :  { %v581_v27 = vmul.u32.u64.low %v556_v45, %v81_v25  ;;  %v582_v28 = vmul.u32.u64.high %v556_v45, %v81_v25, %v581_v27  ;;  %v585_v30 = vmul.u32.u64.low %v556_v45, %v77_v24  ;;  %v586_v32 = vmul.u32.u64.high %v556_v45, %v77_v24, %v585_v30 }
  0x9b   :  { %v293_v35 = vsub.s32 32, %v292_v22  ;;  %v295_v37 = vshll.u32 %v486_v49, %v292_v22  ;;  %v298_v38 = vshll.u32 %v487_v51, %v292_v22  ;;  %v301_v39 = vshll.u32 %v488_v54, %v292_v22 }
  0x9c   :  { %v304_v40 = vshll.u32 %v489_v56, %v292_v22  ;;  %v307_v44 = vshll.u32 %v490_v58, %v292_v22  ;;  %vm91_vm7 = vc.u32 %v582_v28, %v585_v30  ;;  %v92_v45 = vadd.s32 1, %v586_v32 }
  0x9d   :  { %v296_v41 = vshrl.u32 %v487_v51, %v293_v35  ;;  %v299_v42 = vshrl.u32 %v488_v54, %v293_v35  ;;  %v302_v43 = vshrl.u32 %v489_v56, %v293_v35  ;;  %v305_v46 = vshrl.u32 %v490_v58, %v293_v35 }
  0x9e   :  { %vm311_vm8 = vcmp.lt.s32.totalorder %v291_v17, 2  ;;  %v308_v52 = vshrl.u32 %v491_v1, %v293_v35  ;;  %v93_v53 = vsel %vm91_vm7, %v92_v45, %v586_v32  ;;  %v294_v55 = vshrl.u32 %v486_v49, %v293_v35 }
  0x9f   :  { %v297_v47 = vor.u32 %v296_v41, %v295_v37  ;;  %v300_v48 = vor.u32 %v299_v42, %v298_v38  ;;  %v303_v50 = vor.u32 %v302_v43, %v301_v39  ;;  %v306_v57 = vor.u32 %v305_v46, %v304_v40 }
  0xa0   :  { %vm313_vm9 = vcmp.lt.s32.totalorder %v291_v17, 4  ;;  %v94_v59 = vadd.s32 %v93_v53, %v89_v34  ;;  %v309_v60 = vor.u32 %v308_v52, %v307_v44  ;;  %vm312_vm11 = vcmp.lt.s32.totalorder %v291_v17, 3 }
  0xa1   :  { %v315_v61 = vsel %vm313_vm9, %v303_v50, 2102212464  ;;  %v318_v62 = vsel %vm310_vm6, %v297_v47, %v300_v48  ;;  %v319_v63 = vsel %vm313_vm9, %v306_v57, 920167782  ;;  %v322_v0 = vsel %vm310_vm6, %v300_v48, %v303_v50 }
  0xa2   :  { %v95_v2 = vadd.s32 536870912, %v94_v59  ;;  %v314_v3 = vsel %vm310_vm6, %v294_v55, %v297_v47  ;;  %v320_v4 = vsel %vm312_vm11, %v303_v50, %v319_v63  ;;  %v323_v5 = vsel %vm313_vm9, %v309_v60, 1326507024 }
  0xa3   :  { %v316_v6 = vsel %vm312_vm11, %v300_v48, %v315_v61  ;;  %v321_v7 = vsel %vm311_vm8, %v318_v62, %v320_v4  ;;  %v324_v8 = vsel %vm312_vm11, %v306_v57, %v323_v5  ;;  %v168_v9 = vsel %vm167_vm10, %v166_v36, 0 }
  0xa4   :  { %v609_v11 = vshrl.u32 %v95_v2, 30  ;;  %v325_v12 = vsel %vm311_vm8, %v322_v0, %v324_v8  ;;  %v613_v13 = vmul.u32.u64.low %v578_v26, %v321_v7  ;;  %v614_v14 = vmul.u32.u64.high %v578_v26, %v321_v7, %v613_v13 }
  0xa5   :  { %v618_v15 = vmul.u32.u64.low %v578_v26, %v325_v12  ;;  %v619_v16 = vmul.u32.u64.high %v578_v26, %v325_v12, %v618_v15  ;;  %v170_v18 = vand.u32 31, %v168_v9  ;;  %v317_v20 = vsel %vm311_vm8, %v314_v3, %v316_v6 }
  0xa6   :  { %v97_v19 = vshll.u32 %v609_v11, 30  ;;  %v156_v22 = vand.u32 2147483647, %v549_v31  ;;  %v336_v27 = vadd.s32 1, %v614_v14  ;;  %v333_v32 = vmul.u32 %v578_v26, %v317_v20 }
  0xa7   :  { %v171_v24 = vsub.s32 32, %v170_v18  ;;  %vm335_vm12 = vc.u32 %v619_v16, %v613_v13  ;;  %v182_v40 = vshll.u32 %v489_v56, %v170_v18  ;;  %v169_v42 = vshrl.u32 %v168_v9, 5 }
  0xa8   :  { %v98_v25 = vsub.s32 %v94_v59, %v97_v19  ;;  %v337_v35 = vsel %vm335_vm12, %v336_v27, %v614_v14  ;;  %v163_v36 = vand.u32 8388607, %v156_v22  ;;  %v173_v46 = vshll.u32 %v486_v49, %v170_v18 }
  0xa9   :  { %v338_v37 = vadd.s32 %v337_v35, %v333_v32  ;;  %v183_v17 = vshrl.u32 %v490_v58, %v171_v24  ;;  %v174_v39 = vshrl.u32 %v487_v51, %v171_v24  ;;  %v177_v26 = vshrl.u32 %v488_v54, %v171_v24 }
  0xaa   :  { %v100_v34 = vsub.s32 0, %v98_v25  ;;  %v180_v43 = vshrl.u32 %v489_v56, %v171_v24  ;;  %v164_v45 = vor.u32 8388608, %v163_v36  ;;  %v176_v50 = vshll.u32 %v487_v51, %v170_v18 }
  0xab   :  { %v339_v41 = vadd.s32 536870912, %v338_v37  ;;  %v184_v47 = vor.u32 %v183_v17, %v182_v40  ;;  %v179_v52 = vshll.u32 %v488_v54, %v170_v18  ;;  %v186_v53 = vshrl.u32 %v491_v1, %v171_v24 }
  0xac   :  { %v416_v38 = vmin.u32 %v100_v34, %v98_v25  ;;  %v175_v57 = vor.u32 %v174_v39, %v173_v46  ;;  %v185_v59 = vshll.u32 %v490_v58, %v170_v18  ;;  %v178_v56 = vor.u32 %v177_v26, %v176_v50 }
  0xad   :  { %v637_v48 = vshrl.u32 %v339_v41, 30  ;;  %v181_v61 = vor.u32 %v180_v43, %v179_v52  ;;  %vm191_vm13 = vcmp.lt.s32.totalorder %v169_v42, 4  ;;  %v204_v0 = vshll.u32 %v164_v45, 8 }
  0xae   :  { %v102_v44 = vclz %v416_v38  ;;  %v187_v62 = vor.u32 %v186_v53, %v185_v59  ;;  %v197_v63 = vsel %vm191_vm13, %v184_v47, 920167782  ;;  %v90_v51 = vadd.s32 %v585_v30, %v582_v28 }
  0xaf   :  { %v341_v60 = vshll.u32 %v637_v48, 30  ;;  %v172_v1 = vshrl.u32 %v486_v49, %v171_v24  ;;  %vm188_vm15 = vcmp.lt.s32.totalorder %v169_v42, 1  ;;  %vm190_vm0 = vcmp.lt.s32.totalorder %v169_v42, 3 }
  0xb0   :  { %v417_v55 = vadd.s32 4294967294, %v102_v44  ;;  %v196_v5 = vsel %vm188_vm15, %v175_v57, %v178_v56  ;;  %v198_v6 = vsel %vm190_vm0, %v181_v61, %v197_v63  ;;  %v200_v7 = vsel %vm188_vm15, %v178_v56, %v181_v61 }
  0xb1   :  { %v342_v2 = vsub.s32 %v338_v37, %v341_v60  ;;  %v201_v28 = vsel %vm191_vm13, %v187_v62, 1326507024  ;;  %vm189_vm1 = vcmp.lt.s32.totalorder %v169_v42, 2  ;;  %v193_v49 = vsel %vm191_vm13, %v181_v61, 2102212464 }
  0xb2   :  { %vm418_vm14 = vcmp.lt.s32.totalorder %v417_v55, 0  ;;  %v202_v14 = vsel %vm190_vm0, %v184_v47, %v201_v28  ;;  %v199_v19 = vsel %vm189_vm1, %v196_v5, %v198_v6  ;;  %v192_v27 = vsel %vm188_vm15, %v172_v1, %v175_v57 }
  0xb3   :  { %v105_v54 = vsel %vm418_vm14, 0, %v417_v55  ;;  %v344_v58 = vsub.s32 0, %v342_v2  ;;  %v203_v20 = vsel %vm189_vm1, %v200_v7, %v202_v14  ;;  %v194_v32 = vsel %vm190_vm0, %v178_v56, %v193_v49 }
  0xb4   :  { %v106_v3 = vsub.s32 32, %v105_v54  ;;  %v110_v4 = vsub.s32 4294967266, %v105_v54  ;;  %v107_v8 = vshll.u32 %v98_v25, %v105_v54  ;;  %v195_v40 = vsel %vm189_vm1, %v192_v27, %v194_v32 }
  0xb5   :  { %v424_v30 = vmin.u32 %v344_v58, %v342_v2  ;;  %v658_v34 = vmul.u32.u64.low %v204_v0, %v203_v20  ;;  %v659_v35 = vmul.u32.u64.high %v204_v0, %v203_v20, %v658_v34  ;;  %v334_v47 = vadd.s32 %v613_v13, %v619_v16 }
  0xb6   :  { %v108_v9 = vshrl.u32 %v90_v51, %v106_v3  ;;  %v111_v12 = vadd.s32 127, %v110_v4  ;;  %v661_v37 = vmul.u32.u64.low %v204_v0, %v199_v19  ;;  %v662_v17 = vmul.u32.u64.high %v204_v0, %v199_v19, %v661_v37 }
  0xb7   :  { %v346_v24 = vclz %v424_v30  ;;  %v211_v50 = vmul.u32 %v204_v0, %v195_v40  ;;  %vm36_vm4 = vcmp.lt.s32.totalorder %v541_v21, 0  ;;  %v120_v52 = vsub.s32 4, %v609_v11 }
  0xb8   :  { %v109_v15 = vor.u32 %v108_v9, %v107_v8  ;;  %v112_v18 = vshll.u32 %v111_v12, 23  ;;  %vm213_vm3 = vc.u32 %v659_v35, %v661_v37  ;;  %v214_v45 = vadd.s32 1, %v662_v17 }
  0xb9   :  { %v425_v36 = vadd.s32 4294967294, %v346_v24  ;;  %vm676_vm5 = vcmp.le.f32.partialorder %v34_v23, 0.7853982  ;;  %v121_v62 = vsel %vm36_vm4, %v120_v52, %v609_v11  ;;  %vm126_vm6 = vweird.f32 %v541_v21 }
  0xba   :  { %v113_v25 = vor.u32 4788187, %v112_v18  ;;  %v116_v39 = vcvt.s32.f32 %v109_v15  ;;  %v215_v53 = vsel %vm213_vm3, %v214_v45, %v662_v17  ;;  %v123_v51 = vsel %vm676_vm5, 0, %v121_v62 }
  0xbb   :  { %vm426_vm2 = vcmp.lt.s32.totalorder %v425_v36, 0  ;;  %v216_v60 = vadd.s32 %v215_v53, %v211_v50  ;;  %v127_v58 = vadd.s32 3, %v123_v51  ;;  %vm280_vm8 = vcmp.lt.s32.totalorder %v545_v29, 0 }
  0xbc   :  { %v114_v38 = vand.u32 2147483647, %v113_v25  ;;  %v349_v26 = vsel %vm426_vm2, 0, %v425_v36  ;;  %vm695_vm12 = vcmp.le.f32.partialorder %v278_v33, 0.7853982  ;;  %v212_v27 = vadd.s32 %v661_v37, %v659_v35 }
  0xbd   :  { %v350_v43 = vsub.s32 32, %v349_v26  ;;  %v354_v44 = vsub.s32 4294967266, %v349_v26  ;;  %v351_v56 = vshll.u32 %v342_v2, %v349_v26  ;;  %v217_v61 = vadd.s32 536870912, %v216_v60 }
  0xbe   :  { %v117_v41 = vmul.f32 %v116_v39, %v114_v38  ;;  %v128_v7 = vand.u32 3, %v127_v58  ;;  %vm391_vm13 = vcmask 1042432   ;;  %vm158_vm14 = vcmp.lt.s32.totalorder %v549_v31, 0 }
  0xbf   :  { %v355_v42 = vadd.s32 127, %v354_v44  ;;  %v352_v59 = vshrl.u32 %v334_v47, %v350_v43  ;;  %v684_v23 = vshrl.u32 %v217_v61, 30  ;;  %vm157_vm15 = vcmp.le.f32.partialorder %v156_v22, 0.7853982 }
  0xc0   :  { %v118_v46 = vxor.u32 2147483648, %v117_v41  ;;  %vm133_vm7 = vcmp.eq.s32.totalorder %v128_v7, 2  ;;  %vm130_vm9 = vcmp.eq.s32.totalorder %v128_v7, 0  ;;  %vm129_vm11 = vcmp.lt.s32.totalorder %v128_v7, 2 }
  0xc1   :  { %v356_v16 = vshll.u32 %v355_v42, 23  ;;  %v353_v0 = vor.u32 %v352_v59, %v351_v56  ;;  %v219_v1 = vshll.u32 %v684_v23, 30  ;;  %vm370_vm3 = vweird.f32 %v545_v29 }
  0xc2   :  { %v119_v57 = vsel %vm36_vm4, %v118_v46, %v117_v41 }
  0xc3   :  { %v122_v13 = vsel %vm676_vm5, %v541_v21, %v119_v57  ;;  %v357_v63 = vor.u32 4788187, %v356_v16  ;;  %v360_v3 = vcvt.s32.f32 %v353_v0  ;;  %v220_v4 = vsub.s32 %v216_v60, %v219_v1 }
  0xc4   :  { %451 = vcosq.f32 %v122_v13  ;;  %v364_v21 = vsub.s32 4, %v637_v48 }
  0xc5   :  { %453 = vsinq.f32 %v122_v13  ;;  %v358_v54 = vand.u32 2147483647, %v357_v63  ;;  %v222_v6 = vsub.s32 0, %v220_v4 }
  0xc6   :  { %v365_v44 = vsel %vm280_vm8, %v364_v21, %v637_v48 }
  0xc7   :  { %v361_v5 = vmul.f32 %v360_v3, %v358_v54  ;;  %v420_v2 = vmin.u32 %v222_v6, %v220_v4  ;;  %v367_v47 = vsel %vm695_vm12, 0, %v365_v44 }
  0xc8   :  { %v371_v42 = vadd.s32 3, %v367_v47 }
  0xc9   :  { %v362_v8 = vxor.u32 2147483648, %v361_v5  ;;  %v224_v11 = vclz %v420_v2 }
  0xca   :  { %v372_v57 = vand.u32 3, %v371_v42 }
  0xcb   :  { %v421_v30 = vadd.s32 4294967294, %v224_v11  ;;  %v363_v15 = vsel %vm280_vm8, %v362_v8, %v361_v5  ;;  %vm394_vm8 = vcmask 1040384  }
  0xcc   :  { %v366_v36 = vsel %vm695_vm12, %v545_v29, %v363_v15  ;;  %vm374_vm0 = vcmp.eq.s32.totalorder %v372_v57, 0  ;;  %vm377_vm1 = vcmp.eq.s32.totalorder %v372_v57, 2  ;;  %vm373_vm2 = vcmp.lt.s32.totalorder %v372_v57, 2 }
  0xcd   :  { %vm422_vm10 = vcmp.lt.s32.totalorder %v421_v30, 0  ;;  %455 = vcosq.f32 %v366_v36 }
  0xce   :  { %v227_v20 = vsel %vm422_vm10, 0, %v421_v30  ;;  %457 = vsinq.f32 %v366_v36 }
  0xcf   :  { %v228_v25 = vsub.s32 32, %v227_v20  ;;  %v232_v32 = vsub.s32 4294967266, %v227_v20  ;;  %v229_v17 = vshll.u32 %v220_v4, %v227_v20 }
  0xd1   :  { %v452_v9 = vpop.eup %451  ;;  %v230_v38 = vshrl.u32 %v212_v27, %v228_v25  ;;  %v233_v39 = vadd.s32 127, %v232_v32 }
  0xd2   :  { %v454_v12 = vpop.eup %453  ;;  %v134_v28 = vxor.u32 2147483648, %v452_v9 }
  0xd3   :  { %v131_v49 = vxor.u32 2147483648, %v454_v12  ;;  %v231_v40 = vor.u32 %v230_v38, %v229_v17  ;;  %v234_v41 = vshll.u32 %v233_v39, 23 }
  0xd4   :  { %v135_v14 = vsel %vm133_vm7, %v134_v28, %v454_v12  ;;  %vm248_vm7 = vweird.f32 %v549_v31 }
  0xd5   :  { %v132_v18 = vsel %vm130_vm9, %v452_v9, %v131_v49  ;;  %v235_v37 = vor.u32 4788187, %v234_v41  ;;  %v238_v43 = vcvt.s32.f32 %v231_v40 }
  0xd6   :  { %v136_v24 = vsel %vm129_vm11, %v132_v18, %v135_v14 }
  0xd7   :  { %v703_v34 = vsel %vm126_vm6, nan, %v136_v24  ;;  %v236_v26 = vand.u32 2147483647, %v235_v37 }
  0xd8   :  { %v383_v33 = vrot.slane %v703_v34, 5 }
  0xd9   :  { %v239_v45 = vmul.f32 %v238_v43, %v236_v26 }
  0xda   :  { %v392_v35 = vsel %vm391_vm13, %v536_v10, %v383_v33  ;;  %v242_v10 = vsub.s32 4, %v684_v23  ;;  %v456_v53 = vpop.eup %455 }
  0xdb   :  { %396 = vst [vmem:[#allocation2] sm:$0xff] %v392_v35  ;;  %v240_v46 = vxor.u32 2147483648, %v239_v45  ;;  %v458_v55 = vpop.eup %457  ;;  %v378_v13 = vxor.u32 2147483648, %v456_v53 }
  0xdc   :  { %v243_v48 = vsel %vm158_vm14, %v242_v10, %v684_v23  ;;  %v375_v60 = vxor.u32 2147483648, %v458_v55 }
  0xdd   :  { %v241_v50 = vsel %vm158_vm14, %v240_v46, %v239_v45  ;;  %v245_v59 = vsel %vm157_vm15, 0, %v243_v48  ;;  %v379_v61 = vsel %vm377_vm1, %v378_v13, %v458_v55 }
  0xde   :  { %v244_v52 = vsel %vm157_vm15, %v549_v31, %v241_v50  ;;  %v249_v16 = vadd.s32 3, %v245_v59  ;;  %v376_v56 = vsel %vm374_vm0, %v456_v53, %v375_v60 }
  0xdf   :  { %459 = vcosq.f32 %v244_v52  ;;  %v380_v62 = vsel %vm373_vm2, %v376_v56, %v379_v61 }
  0xe0   :  { %461 = vsinq.f32 %v244_v52  ;;  %v250_v22 = vand.u32 3, %v249_v16  ;;  %v381_v23 = vsel %vm370_vm3, nan, %v380_v62 }
  0xe1   :  { %v389_v4 = vrot.slane %v381_v23, 7 }
  0xe2   :  { %vm255_vm4 = vcmp.eq.s32.totalorder %v250_v22, 2  ;;  %vm252_vm5 = vcmp.eq.s32.totalorder %v250_v22, 0  ;;  %vm251_vm6 = vcmp.lt.s32.totalorder %v250_v22, 2 }
  0xec   :  { %v460_v63 = vpop.eup %459 }
  0xed   :  { %v462_v0 = vpop.eup %461  ;;  %v256_v51 = vxor.u32 2147483648, %v460_v63 }
  0xee   :  { %v253_v54 = vxor.u32 2147483648, %v462_v0 }
  0xef   :  { %v257_v1 = vsel %vm255_vm4, %v256_v51, %v462_v0 }
  0xf0   :  { %v254_v3 = vsel %vm252_vm5, %v460_v63, %v253_v54 }
  0xf1   :  { %v258_v58 = vsel %vm251_vm6, %v254_v3, %v257_v1 }
  0xf2   :  { %v259_v5 = vsel %vm248_vm7, nan, %v258_v58 }
  0xf3   :  { %v386_v6 = vrot.slane %v259_v5, 5 }
  0xf5   :  { %v393_v29 = vsel %vm391_vm13, %v383_v33, %v386_v6  ;;  %v395_v2 = vsel %vm394_vm8, %v386_v6, %v389_v4 }
  0xf6   :  { %397 = vst [vmem:[#allocation2 + $0x8] sm:$0xff] %v393_v29  ;;  %398 = vst [vmem:[#allocation2 + $0x10] sm:$0x1f] %v395_v2 }
  0xf7   :  { %474 = shalt.err (!%p471_p4)
}
  0xf8   :  { %s493_s26 = smov 128   ;;  %s494_s27 = smov 8  }
  0xf9   :  { %410 = dma.vmem_to_hbm [thread:$0]  %s405_s1, 384, %s732_s3, [#allocation3], %s493_s26, %s493_s26, %s494_s27  }
  0xfa   :  { %483 = dma.done.wait [#allocation3], 384  }
  0xfb   :  { %484 = vsyncadd [#allocation3], 4294966912 }
  0xfc   :  { %414 = vsyncpa [#allocation3], 1 }

</bundles_post_ra>
